<compile_context>
chip_gen: v6e
topology: v6e:2x2x1
jax: 0.10.0
libtpu: 0.0.40
codegen_flags: <defaults>
</compile_context>

<pallas_src>
import functools
import math

import jax
import jax.numpy as jnp
import numpy as np
from jax import lax
from jax.experimental import pallas as pl
from jax.experimental.pallas import tpu as pltpu

EPS = 1e-3  # BatchNorm2d(eps=0.001) in the reference module


# ---------------------------------------------------------------------------
# Pallas kernel: fused (3x3 s2 conv as matmul) + bias + ReLU
# ---------------------------------------------------------------------------
def _stem_kernel(w_ref, b_ref, x_ref, o_ref):
    # w_ref: (Cout, K)   BN-scale-folded weights (weight-stationary), K = Cin*9
    # b_ref: (Cout, 1)   folded BatchNorm bias (f32)
    # x_ref: (1, K, TS)  im2col patches, spatial tile TS on the lane axis
    # o_ref: (1, Cout, TS)
    y = jnp.dot(w_ref[...], x_ref[0], preferred_element_type=jnp.float32)  # (Cout, TS)
    y = y + b_ref[...]
    o_ref[0] = jnp.maximum(y, 0.0).astype(o_ref.dtype)


# ---------------------------------------------------------------------------
# Tile selection for the flattened output-spatial axis
# ---------------------------------------------------------------------------
def _pick_spatial_tile(S, n_batch, tile_s):
    """Pick lane-tile TS and padded extent Spad for the flattened spatial axis.

    Preference: (1) whole axis if it fits the target, (2) the largest 128-multiple
    divisor of S (exact tiling -> no padding, no post-kernel slice copy),
    (3) pad to a multiple of a 128-aligned tile (rare fallback).
    When n_batch == 1 the axis is split so both v7x TensorCores get work.
    """
    target = int(tile_s)
    if n_batch == 1 and S >= 256:
        target = min(target, max(128, S // 2))
    if S <= target:
        return S, S
    best = 0
    d = 128
    while d <= target:
        if S % d == 0:
            best = d
        d += 128
    if best >= max(1024, target // 8):
        return best, S          # exact tiling, no padding
    # fallback: minimal padding, 128-aligned tiles
    nblk = pl.cdiv(S, target)
    TS = pl.cdiv(pl.cdiv(S, nblk), 128) * 128
    return TS, nblk * TS


# ---------------------------------------------------------------------------
# Wrapper
# ---------------------------------------------------------------------------
def conv3x3s2_bn_relu(x, w_folded, bias, *, compute_dtype=jnp.bfloat16,
                      out_dtype=jnp.float32, tile_s=16384):
    """x: (N, Cin, H, W) f32.  w_folded: (Cout, Cin, 3, 3) with BN scale folded in.
    Returns (N, Cout, Ho, Wo) in out_dtype."""
    N, Cin, H, W = x.shape
    Cout = w_folded.shape[0]
    Ho = (H - 1) // 2 + 1
    Wo = (W - 1) // 2 + 1
    S = Ho * Wo
    K = Cin * 9

    # Stride-2 im2col (only the strided output positions are built), materialized
    # directly in the (bf16) compute dtype to halve its HBM footprint.
    xpad = jnp.pad(x.astype(compute_dtype), ((0, 0), (0, 0), (1, 1), (1, 1)))
    cols = [xpad[:, :, kh:kh + 2 * Ho:2, kw:kw + 2 * Wo:2]
            for kh in range(3) for kw in range(3)]
    patches = jnp.stack(cols, axis=2).reshape(N, K, S)   # K order: ci*9 + kh*3 + kw

    TS, Spad = _pick_spatial_tile(S, N, tile_s)
    if Spad != S:
        # Rare fallback (S has no friendly divisor); padded tail is sliced off below.
        patches = jnp.pad(patches, ((0, 0), (0, 0), (0, Spad - S)))

    wmat = w_folded.reshape(Cout, K).astype(compute_dtype)
    b2 = bias.reshape(Cout, 1).astype(jnp.float32)

    # VMEM budget: double-buffered patch + output blocks + resident weights/bias.
    in_bytes = np.dtype(compute_dtype).itemsize
    out_bytes = np.dtype(out_dtype).itemsize
    vmem_needed = (2 * K * TS * in_bytes + 2 * Cout * TS * out_bytes
                   + Cout * K * in_bytes + 2 * Cout * 4)
    vmem_limit = int(min(max(2 * vmem_needed, 32 << 20), 64 << 20))

    out = pl.pallas_call(
        _stem_kernel,
        out_shape=jax.ShapeDtypeStruct((N, Cout, Spad), out_dtype),
        grid=(N, Spad // TS),
        in_specs=[
            pl.BlockSpec((Cout, K), lambda n, m: (0, 0)),
            pl.BlockSpec((Cout, 1), lambda n, m: (0, 0)),
            pl.BlockSpec((1, K, TS), lambda n, m: (n, 0, m)),
        ],
        out_specs=pl.BlockSpec((1, Cout, TS), lambda n, m: (n, 0, m)),
        compiler_params=pltpu.CompilerParams(
            dimension_semantics=("parallel", "parallel"),
            vmem_limit_bytes=vmem_limit),
    )(wmat, b2, patches)

    if Spad != S:
        out = out[:, :, :S]
    return out.reshape(N, Cout, Ho, Wo)


# ---------------------------------------------------------------------------
# BN folding and module-level forward
# ---------------------------------------------------------------------------
def fold_bn(gamma, beta, mean, var, eps=EPS):
    scale = gamma / jnp.sqrt(var + eps)
    bias = beta - mean * scale
    return scale, bias


def stem_forward(x, w, gamma, beta, mean, var, *, compute_dtype=jnp.bfloat16,
                 out_dtype=jnp.float32):
    """Forward of the PyTorch `stem` module (inference mode, BN folded)."""
    scale, bias = fold_bn(gamma, beta, mean, var)
    w_folded = w * scale[:, None, None, None]   # fold BN scale into the conv weights
    return conv3x3s2_bn_relu(x, w_folded, bias, compute_dtype=compute_dtype,
                             out_dtype=out_dtype)


# ---------------------------------------------------------------------------
# Pure-JAX reference (for correctness check)
# ---------------------------------------------------------------------------
def stem_reference(x, w, gamma, beta, mean, var):
    scale, bias = fold_bn(gamma, beta, mean, var)
    y = lax.conv_general_dilated(
        x, w, (2, 2), [(1, 1), (1, 1)],
        dimension_numbers=("NCHW", "OIHW", "NCHW"),
        precision=lax.Precision.HIGHEST)
    y = y * scale[None, :, None, None] + bias[None, :, None, None]
    return jnp.maximum(y, 0.0)


# ---------------------------------------------------------------------------
if __name__ == "__main__":
    key = jax.random.PRNGKey(0)
    kx, kw, kg, kb, km, kv = jax.random.split(key, 6)

    # Small NCHW input; the module hardcodes 3 input channels (c1 is unused by the conv).
    N, Cin, H, W = 2, 3, 16, 16
    c2 = 32
    x = jax.random.normal(kx, (N, Cin, H, W), jnp.float32)
    w = jax.random.normal(kw, (c2, Cin, 3, 3), jnp.float32) * (1.0 / math.sqrt(Cin * 9))
    gamma = jax.random.uniform(kg, (c2,), jnp.float32, 0.5, 1.5)
    beta = jax.random.normal(kb, (c2,), jnp.float32) * 0.1
    mean = jax.random.normal(km, (c2,), jnp.float32) * 0.1
    var = jax.random.uniform(kv, (c2,), jnp.float32, 0.5, 1.5)

    ref = stem_reference(x, w, gamma, beta, mean, var)

    # Default path: bf16 MXU operands (halves patch/weight HBM bytes), f32 accumulate,
    # f32 output (module semantics).
    fwd_bf16 = jax.jit(functools.partial(stem_forward, compute_dtype=jnp.bfloat16))
    out_bf16 = jax.block_until_ready(fwd_bf16(x, w, gamma, beta, mean, var))
    np.testing.assert_allclose(np.asarray(out_bf16), np.asarray(ref), rtol=5e-2, atol=5e-2)

    # Full f32 path (tight tolerance sanity check).
    fwd_f32 = jax.jit(functools.partial(stem_forward, compute_dtype=jnp.float32))
    out_f32 = jax.block_until_ready(fwd_f32(x, w, gamma, beta, mean, var))
    np.testing.assert_allclose(np.asarray(out_f32), np.asarray(ref), rtol=2e-3, atol=2e-3)

    print("KERNEL_OK")
</pallas_src>

<mosaic_0001>
module attributes {stable_mosaic.version = 11 : i64} {
  func.func @_stem_kernel(%arg0: i32, %arg1: i32, %arg2: memref<32x27xbf16, #tpu.memory_space<vmem>>, %arg3: memref<32x1xf32, #tpu.memory_space<vmem>>, %arg4: memref<1x27x64xbf16, #tpu.memory_space<vmem>>, %arg5: memref<1x32x64xf32, #tpu.memory_space<vmem>>) attributes {dimension_semantics = [#tpu.dimension_semantics<parallel>, #tpu.dimension_semantics<parallel>], iteration_bounds = array<i64: 2, 1>, scalar_prefetch = 0 : i64, scratch_operands = 0 : i64, tpu.core_type = #tpu.core_type<tc>, window_params = [{pipeline_mode = #tpu.pipeline_mode<synchronous>, transform_indices = @transform_0, window_bounds = array<i64: 32, 27>}, {pipeline_mode = #tpu.pipeline_mode<synchronous>, transform_indices = @transform_1, window_bounds = array<i64: 32, 1>}, {transform_indices = @transform_2, window_bounds = array<i64: 1, 27, 64>}, {transform_indices = @transform_3, window_bounds = array<i64: 1, 32, 64>}]} {
    %c0 = arith.constant 0 : index
    %c0_0 = arith.constant 0 : index
    %0 = vector.load %arg2[%c0, %c0_0] : memref<32x27xbf16, #tpu.memory_space<vmem>>, vector<32x27xbf16>
    %c0_1 = arith.constant 0 : index
    %c0_2 = arith.constant 0 : index
    %c0_3 = arith.constant 0 : index
    %1 = vector.load %arg4[%c0_1, %c0_2, %c0_3] : memref<1x27x64xbf16, #tpu.memory_space<vmem>>, vector<1x27x64xbf16>
    %2 = vector.shape_cast %1 : vector<1x27x64xbf16> to vector<27x64xbf16>
    %cst = arith.constant dense<0.000000e+00> : vector<32x64xf32>
    %3 = tpu.matmul %0, %2, %cst {dimension_numbers = #tpu.dot_dimension_numbers<[1], [0], [0], [1], [0, 0, 1, 1], [], []>} : vector<32x27xbf16>, vector<27x64xbf16>, vector<32x64xf32> -> vector<32x64xf32>
    %c0_4 = arith.constant 0 : index
    %c0_5 = arith.constant 0 : index
    %4 = vector.load %arg3[%c0_4, %c0_5] : memref<32x1xf32, #tpu.memory_space<vmem>>, vector<32x1xf32>
    %5 = vector.broadcast %4 : vector<32x1xf32> to vector<32x64xf32>
    %6 = arith.addf %3, %5 : vector<32x64xf32>
    %cst_6 = arith.constant 0.000000e+00 : f32
    %7 = vector.broadcast %cst_6 : f32 to vector<32x64xf32>
    %8 = arith.maximumf %6, %7 : vector<32x64xf32>
    %c0_7 = arith.constant 0 : index
    %c0_8 = arith.constant 0 : index
    %c0_9 = arith.constant 0 : index
    %9 = vector.load %arg5[%c0_7, %c0_8, %c0_9] : memref<1x32x64xf32, #tpu.memory_space<vmem>>, vector<1x32x64xf32>
    %10 = vector.shape_cast %9 : vector<1x32x64xf32> to vector<32x64xf32>
    %11 = vector.shape_cast %8 : vector<32x64xf32> to vector<1x32x64xf32>
    tpu.vector_store %arg5[%c0_7, %c0_8, %c0_9], %11 {strides = array<i32>} : memref<1x32x64xf32, #tpu.memory_space<vmem>>, vector<1x32x64xf32>,
    return
  }
  func.func @transform_0(%arg0: i32, %arg1: i32) -> (i32, i32) {
    %c0_i32 = arith.constant 0 : i32
    %c0_i32_0 = arith.constant 0 : i32
    %c0_i32_1 = arith.constant 0 : i32
    return %c0_i32, %c0_i32_0 : i32, i32
  }
  func.func @transform_1(%arg0: i32, %arg1: i32) -> (i32, i32) {
    %c0_i32 = arith.constant 0 : i32
    %c0_i32_0 = arith.constant 0 : i32
    %c0_i32_1 = arith.constant 0 : i32
    return %c0_i32, %c0_i32_0 : i32, i32
  }
  func.func @transform_2(%arg0: i32, %arg1: i32) -> (i32, i32, i32) {
    %c0_i32 = arith.constant 0 : i32
    %c0_i32_0 = arith.constant 0 : i32
    return %arg0, %c0_i32, %arg1 : i32, i32, i32
  }
  func.func @transform_3(%arg0: i32, %arg1: i32) -> (i32, i32, i32) {
    %c0_i32 = arith.constant 0 : i32
    %c0_i32_0 = arith.constant 0 : i32
    return %arg0, %c0_i32, %arg1 : i32, i32, i32
  }
}

</mosaic_0001>

<bundles_post_ra>
// kernel: stem_forward.1
= control target key start
LH: loop header
LB: loop body
LE: loop exit
PB: predicated region body
PF: predicated region fallthrough
CT: control target
= control target key end

     0   :  { %s520_s12 = smov 0   ;;  %s522_s13 = smov 0   ;;  %s581_s0 = inlined_call_operand.vmem [shape: bf16[32,27], index: 0, kind: input, shape index: {}]   ;;  %s582_s1 = inlined_call_operand.vmem [shape: f32[32,1], index: 1, kind: input, shape index: {}]   ;;  %s583_s2 = inlined_call_operand.vmem [shape: bf16[2,27,64], index: 2, kind: input, shape index: {}]   ;;  %s584_s3 = inlined_call_operand.vmem [shape: f32[2,32,64], index: 3, kind: output, shape index: {}]  }
   0x1   :  { %s524_s14 = smov 0  }
   0x2 LB: > { %s25_s15 = sadd.s32 1, %s492_s13  ;;  %p415_p0 = scmp.ge.s32.totalorder %s496_s14, 1  ;;  %s496_s14 = sphi %s524_s14, %s13_s14   ;;  %s492_s13 = sphi %s522_s13, %s586_s13   ;;  %s488_s12 = sphi %s520_s12, %s585_s12  }
   0x3   : > { %p27_p1 = scmp.ge.s32.totalorder %s25_s15, 2  ;;  %p156_p2 = scmp.lt.s32.totalorder %s496_s14, 3 }
   0x5   : > { %s588_s15 = smov (%p27_p1, %s25_s15), 0  ;;  %p157_p3 = pnand %p415_p0, %p156_p2 }
   0x6   : > { %p186_p4 = scmp.lt.s32.totalorder (!%p157_p3), %s488_s12, 1 }
   0x7   : > { %160 = sbr.rel (%p157_p3) target bundleno = 231 (0xe7), region = 32 }
   0xc   : > { %vm263_vm0 = vcmask 1044480   ;;  %vm264_vm1 = vcmask 1045504   ;;  %v472_v0 = vld [vmem:[%s581_s0] sm:$0xff]   ;;  %vm256_vm2 = vcmask 220160   ;;  %s590_s12 = smov (!%p186_p4, %s488_s12), 1  ;;  %v498_v1 = vmov 65535  }
   0xd   : > { %v265_v2 = vsel %vm263_vm0, 4294967295, %v498_v1  ;;  %438 = vmatprep.mubr.msk.bf16.mxu0 %vm256_vm2, %v472_v0  ;;  %v213_v3 = vld [vmem:[%s582_s1 + $0x10] sm:$0xff]  ;;  %v211_v4 = vld [vmem:[%s582_s1] sm:$0xff]  ;;  %s428_s22 = sshll.u32 %s590_s12, 4  ;;  %v499_v5 = vmov 0   ;;  %v214_v7 = vld [vmem:[%s582_s1 + $0x18] sm:$0xff] }
   0xe   : > { %469 = vset.pattern.permute.xlu1 %v499_v5  ;;  %468 = vset.pattern.permute.xlu0 %v499_v5  ;;  %s193_s25 = scalar_lea.vmem %s583_s2, %s428_s22  ;;  %v266_v6 = vsel %vm264_vm1, %v265_v2, 0  ;;  %v212_v8 = vld [vmem:[%s582_s1 + $0x8] sm:$0xff]  ;;  %s429_s5 = sshll.u32 %s590_s12, 5  ;;  %vm323_vm3 = vcmask 523264  }
   0xf   : > { %227 = vperm.xlu1 %469, %v213_v3   ;;  %217 = vperm.xlu0 %468, %v211_v4   ;;  %v470_v9 = vld [vmem:[%s193_s25 + $0x8] sm:$0x3f]   ;;  %v471_v11 = vld [vmem:[%s193_s25] sm:$0xff]   ;;  %s201_s8 = scalar_lea.vmem %s584_s3, %s429_s5 }
  0x10   : > { %v268_v10 = vand.u32 %v470_v9, %v266_v6  ;;  %v473_v12 = vld [vmem:[%s581_s0 + $0x8] sm:$0xff]  }
  0x12   : > { %434 = vmatprep.subr.bf16.mxu0 %v268_v10 }
  0x13   : > { %232 = vperm.xlu1 %469, %v214_v7   ;;  %222 = vperm.xlu0 %468, %v212_v8  }
  0x14   : > { %435 = vmatpush3.bf16.msra.mxu0 %v268_v10 }
  0x15   : > { %436 = vmatprep.subr.bf16.mxu0 %v471_v11 }
  0x18   : > { %437 = vmatpush3.bf16.msra.mxu0 %v471_v11 }
  0x1b   : > { %439 = vmatmul.mubr.msk.bf16.vlgmr.msra.gmra.mxu0 %vm256_vm2, %v473_v12 }
  0x8a   : > { %v228_v13 = vpop.permute.xlu1 %227  ;;  %v218_v14 = vpop.permute.xlu0 %217 }
  0x8e   : > { %v233_v20 = vpop.permute.xlu1 %232  ;;  %v223_v24 = vpop.permute.xlu0 %222 }
  0xdb   : > { %v440_v15 = vpop.f32.mrf.mxu0 }
  0xdc   : > { %v313_v16 = vadd.f32 %v440_v15, %v228_v13 }
  0xdd   : > { %v304_v17 = vpop.f32.mrf.mxu0 }
  0xde   : > { %v321_v18 = vmax.f32 %v313_v16, 0.0  ;;  %v305_v19 = vadd.f32 %v304_v17, %v218_v14 }
  0xdf   : > { %v441_v21 = vpop.f32.mrf.mxu0 }
  0xe0   : > { %326 = vst.msk [vmem:[%s201_s8 + $0x10] sm:$0xff] %vm323_vm3, %v321_v18  ;;  %v319_v22 = vmax.f32 %v305_v19, 0.0  ;;  %v316_v23 = vadd.f32 %v441_v21, %v233_v20 }
  0xe1   : > { %v307_v25 = vpop.f32.mrf.mxu0 }
  0xe2   : > { %324 = vst.msk [vmem:[%s201_s8] sm:$0xff] %vm323_vm3, %v319_v22  ;;  %v322_v26 = vmax.f32 %v316_v23, 0.0  ;;  %v308_v27 = vadd.f32 %v307_v25, %v223_v24 }
  0xe4   : > { %327 = vst.msk [vmem:[%s201_s8 + $0x18] sm:$0xff] %vm323_vm3, %v322_v26  ;;  %v320_v28 = vmax.f32 %v308_v27, 0.0 }
  0xe6   : > { %325 = vst.msk [vmem:[%s201_s8 + $0x8] sm:$0xff] %vm323_vm3, %v320_v28 }
  0xe7 PF: > { %s13_s14 = sadd.s32 1, %s496_s14   ;;  %s585_s12 = smov %s492_s13 }
  0xe8   : > { %p10_p5 = scmp.ge.s32.totalorder %s13_s14, 4   ;;  %s586_s13 = smov %s588_s15 }
  0xea   :  { %12 = sbr.rel (!%p10_p5) target bundleno = 2 (0x2), region = 62 }

</bundles_post_ra>
